<compile_context>
chip_gen: v5e
topology: v5e:2x2
jax: 0.10.0
libtpu: 0.0.40
codegen_flags: <defaults>
</compile_context>

<pallas_src>
import functools

import jax
import jax.numpy as jnp
from jax.experimental import pallas as pl
from jax.experimental.pallas import tpu as pltpu


_TARGET_X_BLOCK_BYTES = 4 * 1024 * 1024   # ~1-8 MiB blocks hit the HBM roofline
_MIN_X_BLOCK_BYTES = 512 * 1024           # below this, per-step overhead dominates
_MIN_GRID_STEPS = 8                       # >=8 steps => v7x's 2 TCs get >=4 pipelined steps each
_LANE = 128


def _round_up(x, m):
    return ((x + m - 1) // m) * m


def _vmem_capacity_bytes():
    """Generation-aware physical VMEM per TensorCore, conservative fallback."""
    try:
        cap = getattr(pltpu.get_tpu_info(), "vmem_capacity_bytes", None)
        if cap:
            return int(cap)
    except Exception:
        pass
    return 64 * 1024 * 1024   # v7x per-TC size = smallest across v5e/v6e/v7x


# ---------------- fused single-pass kernel (whole image fits VMEM) ----------

def _se_fused_kernel(x_ref, w1_ref, w2_ref, o_ref, *, inv_hw):
    # x_ref : (TB, C, HWp)  batch tile, native dtype, spatial on lanes
    # w1_ref: (C, C_r)      fc1^T     w2_ref: (C_r, C)  fc2^T
    # Squeeze: f32 accumulation; divide by the *true* HW so zero-padded lanes
    # don't bias the mean.
    pooled = jnp.sum(x_ref[...], axis=-1, dtype=jnp.float32) * inv_hw        # (TB, C)
    # Excitation: MXU operands in the weights' dtype (bf16 single-pass on all
    # generations when x is bf16), f32 accumulate.
    h = jnp.dot(pooled.astype(w1_ref.dtype), w1_ref[...],
                preferred_element_type=jnp.float32)
    h = jnp.maximum(h, 0.0)
    y = jnp.dot(h.astype(w2_ref.dtype), w2_ref[...],
                preferred_element_type=jnp.float32)
    y = jax.nn.sigmoid(y)                                                     # (TB, C)
    # Rescale in the input's native dtype; no extra VPU work in this path.
    o_ref[...] = x_ref[...] * y.astype(o_ref.dtype)[:, :, None]


# ------------- spatially-tiled two-pass path (large C*HW images) ------------

def _se_pool_excite_kernel(x_ref, w1_ref, w2_ref, gate_ref, acc_ref, *, inv_hw):
    # Pass 1: grid = (batch tiles, HW tiles); HW is an 'arbitrary' reduction
    # axis accumulated into a tiny f32 VMEM scratch.
    j = pl.program_id(1)

    @pl.when(j == 0)
    def _init():
        acc_ref[...] = jnp.zeros_like(acc_ref)

    acc_ref[...] += jnp.sum(x_ref[...], axis=-1, dtype=jnp.float32)

    @pl.when(j == pl.num_programs(1) - 1)
    def _finalize():
        pooled = acc_ref[...] * inv_hw
        h = jnp.dot(pooled.astype(w1_ref.dtype), w1_ref[...],
                    preferred_element_type=jnp.float32)
        h = jnp.maximum(h, 0.0)
        y = jnp.dot(h.astype(w2_ref.dtype), w2_ref[...],
                    preferred_element_type=jnp.float32)
        y = jax.nn.sigmoid(y)
        gate_ref[...] = y.astype(gate_ref.dtype)[:, :, None]                 # (TB, C, 1)


def _se_rescale_kernel(x_ref, gate_ref, o_ref):
    # Pass 2: re-stream x and apply the per-(image, channel) gate.
    o_ref[...] = x_ref[...] * gate_ref[...]


# --------------------------------- wrapper ----------------------------------

def se_layer(x, w1, w2, *, block_budget_bytes=None):
    """SELayer.forward: x * sigmoid(relu(mean_hw(x) @ w1.T) @ w2.T).

    x : (B, C, H, W) NCHW.  w1: (C_r, C) fc1 weight.  w2: (C, C_r) fc2 weight.
    """
    b, c, h, w = x.shape
    c_r = w1.shape[0]
    hw = h * w
    itemsize = x.dtype.itemsize

    # Generation-aware VMEM budgets: 64 MiB scoped on v5e/v6e (128 MiB
    # physical), 32 MiB on v7x (64 MiB physical per TC).
    vmem_cap = _vmem_capacity_bytes()
    vmem_limit = max(32 * 1024 * 1024, min(vmem_cap // 2, 64 * 1024 * 1024))
    if block_budget_bytes is None:
        block_budget_bytes = vmem_limit - 4 * 1024 * 1024   # headroom: weights/scratch/sems

    # Weights: pre-transpose; keep x's native dtype for low-precision inputs
    # (native single-pass MXU operand, half the resident VMEM), f32 otherwise.
    w_dtype = x.dtype if itemsize < 4 else jnp.float32
    w1_t = w1.T.astype(w_dtype)   # (C, C_r)
    w2_t = w2.T.astype(w_dtype)   # (C_r, C)
    weight_bytes = 2 * c * c_r * jnp.dtype(w_dtype).itemsize

    inv_hw = 1.0 / float(hw)
    hw_p = _round_up(hw, _LANE)                 # lane-dense loads/stores
    per_image_bytes = c * hw_p * itemsize       # one image's x block

    if 4 * per_image_bytes <= block_budget_bytes:
        # -------------------------- fused single-pass path -------------------
        x_flat = x.reshape(b, c, hw)
        if hw_p != hw:
            x_flat = jnp.pad(x_flat, ((0, 0), (0, 0), (0, hw_p - hw)))

        # Batch tile: ~4 MiB x blocks and >= _MIN_GRID_STEPS grid steps, unless
        # the whole problem is so small that splitting only adds per-step
        # overhead (then collapse toward grid=(1,)).
        tb = max(1, _TARGET_X_BLOCK_BYTES // per_image_bytes)
        tb_steps = max(1, b // min(b, _MIN_GRID_STEPS))
        if tb_steps * per_image_bytes >= _MIN_X_BLOCK_BYTES:
            tb = min(tb, tb_steps)
        tb = min(tb, max(1, block_budget_bytes // (4 * per_image_bytes)), b)
        grid = (pl.cdiv(b, tb),)
        # NOTE: when b % tb != 0 the padded tail rows feed garbage into the
        # sigmoid, but that region is never written back (masked writeback).

        cost = pl.CostEstimate(
            flops=int(2 * b * c * hw + 4 * b * c * c_r),
            transcendentals=int(b * c),
            bytes_accessed=int(2 * b * c * hw * itemsize + weight_bytes),
        )

        out = pl.pallas_call(
            functools.partial(_se_fused_kernel, inv_hw=inv_hw),
            out_shape=jax.ShapeDtypeStruct((b, c, hw_p), x.dtype),
            grid_spec=pltpu.PrefetchScalarGridSpec(
                num_scalar_prefetch=0,
                grid=grid,
                in_specs=[
                    pl.BlockSpec((tb, c, hw_p), lambda i: (i, 0, 0)),
                    pl.BlockSpec((c, c_r), lambda i: (0, 0)),
                    pl.BlockSpec((c_r, c), lambda i: (0, 0)),
                ],
                out_specs=pl.BlockSpec((tb, c, hw_p), lambda i: (i, 0, 0)),
            ),
            compiler_params=pltpu.CompilerParams(
                dimension_semantics=("parallel",),
                vmem_limit_bytes=vmem_limit),
            cost_estimate=cost,
        )(x_flat, w1_t, w2_t)

        if hw_p != hw:
            out = out[:, :, :hw]
        return out.reshape(b, c, h, w)

    # ------------- spatially-tiled two-pass path (one image too big) ---------
    # HW tile: multiple of 128 lanes, ~4 MiB per block, double-buffered
    # in + out blocks within budget.
    lane_bytes = c * itemsize * _LANE
    lanes = max(1, min(_TARGET_X_BLOCK_BYTES // lane_bytes,
                       max(1, block_budget_bytes // (4 * lane_bytes))))
    hw_tile = _LANE * lanes
    hw_pt = _round_up(hw, hw_tile)   # pad with real zeros -> pool sum stays exact
    n_hw = hw_pt // hw_tile
    tb = 1                           # this path only triggers when one image is large

    x_flat = x.reshape(b, c, hw)
    if hw_pt != hw:
        x_flat = jnp.pad(x_flat, ((0, 0), (0, 0), (0, hw_pt - hw)))

    pool_cost = pl.CostEstimate(
        flops=int(b * c * hw + 4 * b * c * c_r),
        transcendentals=int(b * c),
        bytes_accessed=int(b * c * hw * itemsize + b * c * itemsize + weight_bytes),
    )
    gate = pl.pallas_call(
        functools.partial(_se_pool_excite_kernel, inv_hw=inv_hw),
        out_shape=jax.ShapeDtypeStruct((b, c, 1), x.dtype),
        grid_spec=pltpu.PrefetchScalarGridSpec(
            num_scalar_prefetch=0,
            grid=(pl.cdiv(b, tb), n_hw),
            in_specs=[
                pl.BlockSpec((tb, c, hw_tile), lambda i, j: (i, 0, j)),
                pl.BlockSpec((c, c_r), lambda i, j: (0, 0)),
                pl.BlockSpec((c_r, c), lambda i, j: (0, 0)),
            ],
            out_specs=pl.BlockSpec((tb, c, 1), lambda i, j: (i, 0, 0)),
            scratch_shapes=[pltpu.VMEM((tb, c), jnp.float32)],
        ),
        compiler_params=pltpu.CompilerParams(
            dimension_semantics=("parallel", "arbitrary"),
            vmem_limit_bytes=vmem_limit),
        cost_estimate=pool_cost,
    )(x_flat, w1_t, w2_t)

    rescale_cost = pl.CostEstimate(
        flops=int(b * c * hw),
        transcendentals=0,
        bytes_accessed=int(2 * b * c * hw * itemsize + b * c * itemsize),
    )
    out = pl.pallas_call(
        _se_rescale_kernel,
        out_shape=jax.ShapeDtypeStruct((b, c, hw_pt), x.dtype),
        grid_spec=pltpu.PrefetchScalarGridSpec(
            num_scalar_prefetch=0,
            grid=(pl.cdiv(b, tb), n_hw),
            in_specs=[
                pl.BlockSpec((tb, c, hw_tile), lambda i, j: (i, 0, j)),
                pl.BlockSpec((tb, c, 1), lambda i, j: (i, 0, 0)),
            ],
            out_specs=pl.BlockSpec((tb, c, hw_tile), lambda i, j: (i, 0, j)),
        ),
        compiler_params=pltpu.CompilerParams(
            dimension_semantics=("parallel", "parallel"),
            vmem_limit_bytes=vmem_limit),
        cost_estimate=rescale_cost,
    )(x_flat, gate)

    if hw_pt != hw:
        out = out[:, :, :hw]
    return out.reshape(b, c, h, w)


def se_layer_ref(x, w1, w2):
    """Pure-JAX reference mirroring the PyTorch forward."""
    y = jnp.mean(x.astype(jnp.float32), axis=(2, 3))         # (B, C)
    y = jnp.maximum(y @ w1.T.astype(jnp.float32), 0.0)       # fc1 + ReLU
    y = jax.nn.sigmoid(y @ w2.T.astype(jnp.float32))         # fc2 + sigmoid
    return x * y.astype(x.dtype)[:, :, None, None]


if __name__ == "__main__":
    # SELayer(channel=16, reduction=8) -> fc1: (2, 16), fc2: (16, 2)
    B, C, H, W = 8, 16, 16, 16
    reduction = 8
    C_r = C // reduction

    key = jax.random.PRNGKey(0)
    kx, k1, k2, kx2 = jax.random.split(key, 4)
    x = jax.random.normal(kx, (B, C, H, W), dtype=jnp.float32)
    # Deterministic synthetic Linear weights (PyTorch (out, in) convention).
    w1 = jax.random.normal(k1, (C_r, C), dtype=jnp.float32) * 0.1
    w2 = jax.random.normal(k2, (C, C_r), dtype=jnp.float32) * 0.1

    # Fused single-pass path.
    out = jax.block_until_ready(se_layer(x, w1, w2))
    ref = se_layer_ref(x, w1, w2)
    assert out.shape == (B, C, H, W)
    assert jnp.allclose(out, ref, atol=1e-5, rtol=1e-5), "fused path mismatch"

    # Spatially-tiled two-pass fallback (forced via a tiny block budget) with a
    # non-multiple-of-128 spatial size to also exercise the HW padding path.
    x2 = jax.random.normal(kx2, (4, C, 20, 20), dtype=jnp.float32)
    out2 = jax.block_until_ready(
        se_layer(x2, w1, w2, block_budget_bytes=64 * 1024))
    ref2 = se_layer_ref(x2, w1, w2)
    assert out2.shape == x2.shape
    assert jnp.allclose(out2, ref2, atol=1e-5, rtol=1e-5), "spatial path mismatch"

    print("KERNEL_OK")
</pallas_src>

<mosaic_0001>
module attributes {stable_mosaic.version = 11 : i64} {
  func.func @_se_fused_kernel(%arg0: i32, %arg1: memref<8x16x256xf32, #tpu.memory_space<vmem>>, %arg2: memref<16x2xf32, #tpu.memory_space<vmem>>, %arg3: memref<2x16xf32, #tpu.memory_space<vmem>>, %arg4: memref<8x16x256xf32, #tpu.memory_space<vmem>>) attributes {dimension_semantics = [#tpu.dimension_semantics<parallel>], iteration_bounds = array<i64: 1>, scalar_prefetch = 0 : i64, scratch_operands = 0 : i64, tpu.core_type = #tpu.core_type<tc>, window_params = [{transform_indices = @transform_0, window_bounds = array<i64: 8, 16, 256>}, {pipeline_mode = #tpu.pipeline_mode<synchronous>, transform_indices = @transform_1, window_bounds = array<i64: 16, 2>}, {pipeline_mode = #tpu.pipeline_mode<synchronous>, transform_indices = @transform_2, window_bounds = array<i64: 2, 16>}, {transform_indices = @transform_3, window_bounds = array<i64: 8, 16, 256>}]} {
    %c0 = arith.constant 0 : index
    %c0_0 = arith.constant 0 : index
    %c0_1 = arith.constant 0 : index
    %0 = vector.load %arg1[%c0, %c0_0, %c0_1] : memref<8x16x256xf32, #tpu.memory_space<vmem>>, vector<8x16x256xf32>
    %cst = arith.constant dense<0.000000e+00> : vector<8x16xf32>
    %1 = vector.multi_reduction <add>, %0, %cst [2] : vector<8x16x256xf32> to vector<8x16xf32>
    %cst_2 = arith.constant 3.906250e-03 : f32
    %2 = vector.broadcast %cst_2 : f32 to vector<8x16xf32>
    %3 = arith.mulf %1, %2 : vector<8x16xf32>
    %c0_3 = arith.constant 0 : index
    %c0_4 = arith.constant 0 : index
    %4 = vector.load %arg2[%c0_3, %c0_4] : memref<16x2xf32, #tpu.memory_space<vmem>>, vector<16x2xf32>
    %cst_5 = arith.constant dense<0.000000e+00> : vector<8x2xf32>
    %5 = tpu.matmul %3, %4, %cst_5 {dimension_numbers = #tpu.dot_dimension_numbers<[1], [0], [0], [1], [0, 0, 1, 1], [], []>} : vector<8x16xf32>, vector<16x2xf32>, vector<8x2xf32> -> vector<8x2xf32>
    %cst_6 = arith.constant 0.000000e+00 : f32
    %6 = vector.broadcast %cst_6 : f32 to vector<8x2xf32>
    %7 = arith.maximumf %5, %6 : vector<8x2xf32>
    %c0_7 = arith.constant 0 : index
    %c0_8 = arith.constant 0 : index
    %8 = vector.load %arg3[%c0_7, %c0_8] : memref<2x16xf32, #tpu.memory_space<vmem>>, vector<2x16xf32>
    %cst_9 = arith.constant dense<0.000000e+00> : vector<8x16xf32>
    %9 = tpu.matmul %7, %8, %cst_9 {dimension_numbers = #tpu.dot_dimension_numbers<[1], [0], [0], [1], [0, 0, 1, 1], [], []>} : vector<8x2xf32>, vector<2x16xf32>, vector<8x16xf32> -> vector<8x16xf32>
    %10 = arith.negf %9 : vector<8x16xf32>
    %11 = math.exp %10 : vector<8x16xf32>
    %cst_10 = arith.constant 1.000000e+00 : f32
    %12 = vector.broadcast %cst_10 : f32 to vector<8x16xf32>
    %13 = arith.addf %12, %11 : vector<8x16xf32>
    %14 = arith.divf %12, %13 : vector<8x16xf32>
    %c0_11 = arith.constant 0 : index
    %c0_12 = arith.constant 0 : index
    %c0_13 = arith.constant 0 : index
    %15 = vector.load %arg1[%c0_11, %c0_12, %c0_13] : memref<8x16x256xf32, #tpu.memory_space<vmem>>, vector<8x16x256xf32>
    %16 = vector.shape_cast %14 : vector<8x16xf32> to vector<8x16x1xf32>
    %17 = vector.broadcast %16 : vector<8x16x1xf32> to vector<8x16x256xf32>
    %18 = arith.mulf %15, %17 : vector<8x16x256xf32>
    %c0_14 = arith.constant 0 : index
    %c0_15 = arith.constant 0 : index
    %c0_16 = arith.constant 0 : index
    %19 = vector.load %arg4[%c0_14, %c0_15, %c0_16] : memref<8x16x256xf32, #tpu.memory_space<vmem>>, vector<8x16x256xf32>
    tpu.vector_store %arg4[%c0_14, %c0_15, %c0_16], %18 {strides = array<i32>} : memref<8x16x256xf32, #tpu.memory_space<vmem>>, vector<8x16x256xf32>,
    return
  }
  func.func @transform_0(%arg0: i32) -> (i32, i32, i32) {
    %c0_i32 = arith.constant 0 : i32
    %c0_i32_0 = arith.constant 0 : i32
    %c0_i32_1 = arith.constant 0 : i32
    return %arg0, %c0_i32, %c0_i32_0 : i32, i32, i32
  }
  func.func @transform_1(%arg0: i32) -> (i32, i32) {
    %c0_i32 = arith.constant 0 : i32
    %c0_i32_0 = arith.constant 0 : i32
    %c0_i32_1 = arith.constant 0 : i32
    return %c0_i32, %c0_i32_0 : i32, i32
  }
  func.func @transform_2(%arg0: i32) -> (i32, i32) {
    %c0_i32 = arith.constant 0 : i32
    %c0_i32_0 = arith.constant 0 : i32
    %c0_i32_1 = arith.constant 0 : i32
    return %c0_i32, %c0_i32_0 : i32, i32
  }
  func.func @transform_3(%arg0: i32) -> (i32, i32, i32) {
    %c0_i32 = arith.constant 0 : i32
    %c0_i32_0 = arith.constant 0 : i32
    %c0_i32_1 = arith.constant 0 : i32
    return %arg0, %c0_i32, %c0_i32_0 : i32, i32, i32
  }
}

</mosaic_0001>

<bundles_post_ra>
// kernel: tpu_custom_call.1
= control target key start
LH: loop header
LB: loop body
LE: loop exit
PB: predicated region body
PF: predicated region fallthrough
CT: control target
= control target key end

     0   :  { %8 = vsyncpa [#allocation3], 0  ;;  %s714_s0 = inlined_call_operand.hbm [shape: f32[8,16,256], index: 0, kind: input, shape index: {}]   ;;  %s715_s1 = inlined_call_operand.vmem [shape: f32[16,2], index: 1, kind: input, shape index: {}]   ;;  %s716_s2 = inlined_call_operand.vmem [shape: f32[2,16], index: 2, kind: input, shape index: {}]   ;;  %s717_s3 = inlined_call_operand.hbm [shape: f32[8,16,256], index: 3, kind: output, shape index: {}]  }
   0x1   :  { %9 = vsyncpa [#allocation4], 0  ;;  %s14_s14 = sshll.u32 %s714_s0, 4  ;;  %s519_s15 = smov [#allocation2]   ;;  %s15_s14 = int_to_ptr.hbm [resolvable:$true] %s14_s14 }
   0x2   :  { %s16_s16 = sshll.u32 %s519_s15, 4  ;;  %s520_s17 = smov 256   ;;  %s17_s16 = int_to_ptr.vmem [resolvable:$true] %s16_s16 }
   0x3   :  { %s521_s18 = smov 16  }
   0x4   :  { %22 = dma.hbm_to_vmem [thread:$0]  %s15_s14, 4096, %s17_s16, [#allocation3], %s520_s17, %s520_s17, %s521_s18  }
   0x5   :  { %515 = dma.done.wait [#allocation3], 4096  }
   0x6   :  { %516 = vsyncadd [#allocation3], 4294963200  ;;  %v549_v0 = vld [vmem:[#allocation2 + $0x40] sm:$0xff]  ;;  %v551_v1 = vld [vmem:[#allocation2 + $0x48] sm:$0xff]  ;;  %v145_v59 = vlaneseq  ;;  %vm150_vm0 = vcmask 130112   ;;  %vm173_vm1 = vcmask 1041409  }
   0x7   :  { %v553_v2 = vld [vmem:[#allocation2 + $0x20] sm:$0xff]  ;;  %v75_v3 = vadd.f32 %v551_v1, %v549_v0  ;;  %v557_v4 = vld [vmem:[#allocation2 + $0x28] sm:$0xff]  ;;  %v567_v9 = vld [vmem:[#allocation2 + $0x50] sm:$0xff]  ;;  %vm175_vm2 = vcmask 1042434   ;;  %vm177_vm3 = vcmask 1043459   ;;  %vm179_vm4 = vcmask 1044484  }
   0x8   :  { %v559_v5 = vld [vmem:[#allocation2] sm:$0xff]  ;;  %v561_v6 = vld [vmem:[#allocation2 + $0x8] sm:$0xff]  ;;  %v69_v7 = vadd.f32 %v557_v4, %v553_v2  ;;  %v569_v10 = vld [vmem:[#allocation2 + $0x58] sm:$0xff]  ;;  %v652_v60 = vand.u32 127, %v145_v59  ;;  %vm181_vm5 = vcmask 1045509   ;;  %vm183_vm6 = vcmask 1046534  }
   0x9   :  { %v63_v8 = vadd.f32 %v561_v6, %v559_v5  ;;  %76 = vadd.xlane.f32.xlu2 %v75_v3  ;;  %v571_v11 = vld [vmem:[#allocation2 + $0x30] sm:$0xff]  ;;  %v573_v12 = vld [vmem:[#allocation2 + $0x38] sm:$0xff]  ;;  %v78_v15 = vadd.f32 %v569_v10, %v567_v9  ;;  %v587_v19 = vld [vmem:[#allocation2 + $0x80] sm:$0xff]  ;;  %vm185_vm7 = vcmask 1047559   ;;  %vm187_vm8 = vcmask 130048   ;;  %s433_s26 = sshll.u32 %s717_s3, 4  ;;  %s434_s26 = int_to_ptr.hbm [resolvable:$true] %s433_s26 }
   0xa   :  { %70 = vadd.xlane.f32.xlu1 %v69_v7  ;;  %v575_v13 = vld [vmem:[#allocation2 + $0x10] sm:$0xff]  ;;  %v577_v14 = vld [vmem:[#allocation2 + $0x18] sm:$0xff]  ;;  %v72_v16 = vadd.f32 %v573_v12, %v571_v11  ;;  %v589_v20 = vld [vmem:[#allocation2 + $0x88] sm:$0xff]  ;;  %v148_v62 = vadd.s32 4294967288, %v652_v60  ;;  %vm216_vm9 = vcmask 1041408   ;;  %vm212_vm10 = vcmask 15360  }
   0xb   :  { %64 = vadd.xlane.f32.xlu0 %v63_v8  ;;  %v66_v17 = vadd.f32 %v577_v14, %v575_v13  ;;  %v585_v18 = vld [vmem:[#allocation2 + $0x70] sm:$0xff]  ;;  %v591_v21 = vld [vmem:[#allocation2 + $0x78] sm:$0xff]  ;;  %v593_v22 = vld [vmem:[#allocation2 + $0x60] sm:$0xff]  ;;  %v87_v24 = vadd.f32 %v589_v20, %v587_v19 }
   0xc   :  { %v595_v23 = vld [vmem:[#allocation2 + $0x68] sm:$0xff]  ;;  %v84_v25 = vadd.f32 %v591_v21, %v585_v18  ;;  %v603_v27 = vld [vmem:[#allocation2 + $0xa0] sm:$0xff]  ;;  %v605_v28 = vld [vmem:[#allocation2 + $0xb0] sm:$0xff] }
   0xd   :  { %v81_v26 = vadd.f32 %v595_v23, %v593_v22  ;;  %v607_v29 = vld [vmem:[#allocation2 + $0xb8] sm:$0xff]  ;;  %v609_v30 = vld [vmem:[#allocation2 + $0xa8] sm:$0xff]  ;;  %v611_v31 = vld [vmem:[#allocation2 + $0x90] sm:$0xff] }
   0xe   :  { %v613_v32 = vld [vmem:[#allocation2 + $0x98] sm:$0xff]  ;;  %v96_v33 = vadd.f32 %v607_v29, %v605_v28  ;;  %v93_v34 = vadd.f32 %v609_v30, %v603_v27  ;;  %v621_v36 = vld [vmem:[#allocation2 + $0xd0] sm:$0xff]  ;;  %v623_v37 = vld [vmem:[#allocation2 + $0xe0] sm:$0xff] }
   0xf   :  { %v90_v35 = vadd.f32 %v613_v32, %v611_v31  ;;  %v625_v38 = vld [vmem:[#allocation2 + $0xe8] sm:$0xff]  ;;  %v627_v39 = vld [vmem:[#allocation2 + $0xd8] sm:$0xff]  ;;  %v629_v40 = vld [vmem:[#allocation2 + $0xc0] sm:$0xff] }
  0x10   :  { %v631_v41 = vld [vmem:[#allocation2 + $0xc8] sm:$0xff]  ;;  %v105_v42 = vadd.f32 %v625_v38, %v623_v37  ;;  %v102_v43 = vadd.f32 %v627_v39, %v621_v36  ;;  %v639_v45 = vld [vmem:[#allocation2 + $0xf0] sm:$0xff]  ;;  %v641_v46 = vld [vmem:[#allocation2 + $0xf8] sm:$0xff] }
  0x11   :  { %79 = vadd.xlane.f32.xlu2 %v78_v15  ;;  %v99_v44 = vadd.f32 %v631_v41, %v629_v40  ;;  %v108_v47 = vadd.f32 %v641_v46, %v639_v45  ;;  %v128_v54 = vld [vmem:[%s715_s1 + $0x8] sm:$0xff]  ;;  %v127_v55 = vld [vmem:[%s715_s1] sm:$0xff] }
  0x12   :  { %73 = vadd.xlane.f32.xlu1 %v72_v16  ;;  %204 = vmatpush.msra.mxu0 %v128_v54 }
  0x13   :  { %67 = vadd.xlane.f32.xlu0 %v66_v17 }
  0x14   :  { %205 = vmatpush.msra.mxu0 %v127_v55 }
  0x19   :  { %88 = vadd.xlane.f32.xlu2 %v87_v24 }
  0x1a   :  { %85 = vadd.xlane.f32.xlu1 %v84_v25 }
  0x1b   :  { %82 = vadd.xlane.f32.xlu0 %v81_v26 }
  0x21   :  { %97 = vadd.xlane.f32.xlu2 %v96_v33 }
  0x22   :  { %94 = vadd.xlane.f32.xlu1 %v93_v34 }
  0x23   :  { %91 = vadd.xlane.f32.xlu0 %v90_v35 }
  0x29   :  { %106 = vadd.xlane.f32.xlu2 %v105_v42 }
  0x2a   :  { %103 = vadd.xlane.f32.xlu1 %v102_v43 }
  0x2b   :  { %100 = vadd.xlane.f32.xlu0 %v99_v44 }
  0x33   :  { %109 = vadd.xlane.f32.xlu0 %v108_v47 }
  0x7c   :  { %v77_v48 = vpop.xlane.xlu2 %76 }
  0x7d   :  { %v71_v49 = vpop.xlane.xlu1 %70  ;;  %v115_v17 = vmul.f32 0.00390625, %v77_v48 }
  0x7e   :  { %v65_v50 = vpop.xlane.xlu0 %64  ;;  %v113_v61 = vmul.f32 0.00390625, %v71_v49 }
  0x7f   :  { %v111_v15 = vmul.f32 0.00390625, %v65_v50  ;;  %v155_v47 = vperm.slane %v115_v17, %v652_v60 }
  0x80   :  { %v152_v24 = vperm.slane %v113_v61, %v652_v60 }
  0x81   :  { %v147_v42 = vperm.slane %v111_v15, %v652_v60 }
  0x84   :  { %v80_v51 = vpop.xlane.xlu2 %79 }
  0x85   :  { %v74_v52 = vpop.xlane.xlu1 %73  ;;  %v116_v25 = vmul.f32 0.00390625, %v80_v51 }
  0x86   :  { %v68_v53 = vpop.xlane.xlu0 %67  ;;  %v114_v63 = vmul.f32 0.00390625, %v74_v52 }
  0x87   :  { %v112_v3 = vmul.f32 0.00390625, %v68_v53  ;;  %v156_v49 = vperm.slane %v116_v25, %v148_v62 }
  0x88   :  { %v153_v26 = vperm.slane %v114_v63, %v148_v62 }
  0x89   :  { %v149_v33 = vperm.slane %v112_v3, %v148_v62 }
  0x8a   :  { %v154_v50 = vsel %vm150_vm0, %v153_v26, %v152_v24 }
  0x8b   :  { %v151_v48 = vsel %vm150_vm0, %v149_v33, %v147_v42 }
  0x8c   :  { %v89_v56 = vpop.xlane.xlu2 %88  ;;  %v174_v15 = vsel %vm173_vm1, %v154_v50, %v151_v48 }
  0x8d   :  { %v86_v57 = vpop.xlane.xlu1 %85  ;;  %v119_v43 = vmul.f32 0.00390625, %v89_v56 }
  0x8e   :  { %v83_v58 = vpop.xlane.xlu0 %82  ;;  %v118_v34 = vmul.f32 0.00390625, %v86_v57 }
  0x8f   :  { %v117_v35 = vmul.f32 0.00390625, %v83_v58  ;;  %v161_v58 = vperm.slane %v119_v43, %v652_v60 }
  0x90   :  { %v159_v51 = vperm.slane %v118_v34, %v148_v62 }
  0x91   :  { %v158_v54 = vperm.slane %v117_v35, %v652_v60 }
  0x93   :  { %v160_v17 = vsel %vm150_vm0, %v159_v51, %v158_v54 }
  0x94   :  { %v98_v16 = vpop.xlane.xlu2 %97 }
  0x95   :  { %v95_v7 = vpop.xlane.xlu1 %94  ;;  %v122_v57 = vmul.f32 0.00390625, %v98_v16 }
  0x96   :  { %v92_v8 = vpop.xlane.xlu0 %91  ;;  %v121_v55 = vmul.f32 0.00390625, %v95_v7 }
  0x97   :  { %v120_v44 = vmul.f32 0.00390625, %v92_v8  ;;  %v157_v8 = vsel %vm150_vm0, %v156_v49, %v155_v47  ;;  %v165_v25 = vperm.slane %v122_v57, %v148_v62 }
  0x98   :  { %v164_v24 = vperm.slane %v121_v55, %v652_v60  ;;  %v176_v34 = vsel %vm175_vm2, %v157_v8, %v174_v15  ;;  %v211_v55 = vld [vmem:[%s716_s2] sm:$0x3]  ;;  %s522_s2 = smov [#allocation5]  }
  0x99   :  { %v162_v61 = vperm.slane %v120_v44, %v148_v62  ;;  %v178_v35 = vsel %vm177_vm3, %v160_v17, %v176_v34  ;;  %447 = vmatpush.msk.msra.mxu1 %vm216_vm9, %v211_v55  ;;  %s431_s23 = sshll.u32 %s522_s2, 4  ;;  %s432_s23 = int_to_ptr.vmem [resolvable:$true] %s431_s23 }
  0x9a   :  { %v166_v43 = vsel %vm150_vm0, %v165_v25, %v164_v24 }
  0x9b   :  { %v163_v7 = vsel %vm150_vm0, %v162_v61, %v161_v58 }
  0x9c   :  { %v107_v3 = vpop.xlane.xlu2 %106  ;;  %v180_v49 = vsel %vm179_vm4, %v163_v7, %v178_v35 }
  0x9d   :  { %v104_v52 = vpop.xlane.xlu1 %103  ;;  %v125_v26 = vmul.f32 0.00390625, %v107_v3 }
  0x9e   :  { %v101_v53 = vpop.xlane.xlu0 %100  ;;  %v124_v56 = vmul.f32 0.00390625, %v104_v52  ;;  %v182_v52 = vsel %vm181_vm5, %v166_v43, %v180_v49 }
  0x9f   :  { %v123_v63 = vmul.f32 0.00390625, %v101_v53  ;;  %v170_v44 = vperm.slane %v125_v26, %v652_v60 }
  0xa0   :  { %v168_v16 = vperm.slane %v124_v56, %v148_v62 }
  0xa1   :  { %v167_v33 = vperm.slane %v123_v63, %v652_v60 }
  0xa3   :  { %v169_v50 = vsel %vm150_vm0, %v168_v16, %v167_v33 }
  0xa4   :  { %v184_v51 = vsel %vm183_vm6, %v169_v50, %v182_v52 }
  0xa6   :  { %v110_v42 = vpop.xlane.xlu0 %109 }
  0xa7   :  { %v126_v47 = vmul.f32 0.00390625, %v110_v42 }
  0xa9   :  { %v171_v48 = vperm.slane %v126_v47, %v148_v62  ;;  %v261_v62 = vshrl.u32 %v145_v59, 7 }
  0xab   :  { %v172_v53 = vsel %vm150_vm0, %v171_v48, %v170_v44  ;;  %456 = vset.pattern.permute.xlu0 %v261_v62  ;;  %454 = vset.pattern.permute.xlu1 %v261_v62  ;;  %v268_v58 = vadd.s32 8, %v261_v62 }
  0xac   :  { %v186_v54 = vsel %vm185_vm7, %v172_v53, %v184_v51 }
  0xad   :  { %446 = vmatmul.msk.f32.vlgmr.msra.gmra.mxu0 %vm187_vm8, %v186_v54  ;;  %455 = vset.pattern.permute.xlu2 %v268_v58 }
 0x12a   :  { %v207_v60 = vpop.f32.mrf.mxu0 }
 0x12b   :  { %v210_v57 = vmax.f32 %v207_v60, 0.0 }
 0x12d   :  { %448 = vmatmul.msk.f32.vlgmr.msra.gmra.mxu1 %vm212_vm10, %v210_v57 }
 0x1aa   :  { %v237_v61 = vpop.f32.mrf.mxu1 }
 0x1ab   :  { %v449_v56 = vmul.f32 -1.442695, %v237_v61 }
 0x1ad   :  { %463 = vpow2.f32 %v449_v56 }
 0x1b3   :  { %v464_v63 = vpop.eup %463 }
 0x1b4   :  { %v243_v3 = vadd.f32 1.0, %v464_v63 }
 0x1b6   :  { %465 = vrcp.f32 %v243_v3  ;;  %v255_v24 = vand.u32 2147483648, %v243_v3  ;;  %v253_v26 = vand.u32 2147483647, %v243_v3  ;;  %vm249_vm12 = vweird.f32 %v243_v3 }
 0x1b8   :  { %v256_v59 = vor.u32 1.1754944e-38, %v255_v24  ;;  %vm254_vm14 = vcmp.eq.f32.partialorder %v253_v26, 8.507059e+37 }
 0x1bc   :  { %v466_v8 = vpop.eup %465 }
 0x1bd   :  { %v245_v15 = vmul.f32 %v466_v8, %v243_v3  ;;  %vm250_vm11 = vweird.f32 %v466_v8 }
 0x1be   :  { %vm251_vm13 = vmor %vm249_vm12, %vm250_vm11 }
 0x1bf   :  { %v246_v17 = vsub.f32 1.0, %v245_v15 }
 0x1c1   :  { %v247_v25 = vmul.f32 %v466_v8, %v246_v17 }
 0x1c3   :  { %v248_v7 = vadd.f32 %v466_v8, %v247_v25 }
 0x1c5   :  { %v252_v16 = vsel %vm251_vm13, %v466_v8, %v248_v7 }
 0x1c6   :  { %v257_v33 = vsel %vm254_vm14, %v256_v59, %v252_v16 }
 0x1c7   :  { %v272_v34 = vperm.slane %v257_v33, 1  ;;  %v259_v35 = vperm.slane %v257_v33, 0  ;;  %v285_v42 = vperm.slane %v257_v33, 2  ;;  %v311_v43 = vperm.slane %v257_v33, 4 }
 0x1c8   :  { %v298_v44 = vperm.slane %v257_v33, 3  ;;  %v350_v47 = vperm.slane %v257_v33, 7  ;;  %v324_v49 = vperm.slane %v257_v33, 5  ;;  %v337_v50 = vperm.slane %v257_v33, 6 }
 0x1c9   :  { %277 = vperm.xlu0 %456, %v272_v34   ;;  %270 = vperm.xlu2 %455, %v259_v35  }
 0x1ca   :  { %264 = vperm.xlu1 %454, %v259_v35  }
 0x1d1   :  { %457 = vset.pattern.permute.xlu0 %v268_v58  ;;  %283 = vperm.xlu2 %455, %v272_v34  }
 0x1d2   :  { %290 = vperm.xlu1 %454, %v285_v42  }
 0x1d9   :  { %322 = vperm.xlu0 %457, %v311_v43   ;;  %296 = vperm.xlu2 %455, %v285_v42  }
 0x1da   :  { %303 = vperm.xlu1 %454, %v298_v44  }
 0x1e1   :  { %460 = vset.pattern.permute.xlu0 %v261_v62  ;;  %309 = vperm.xlu2 %455, %v298_v44  }
 0x1e2   :  { %316 = vperm.xlu1 %454, %v311_v43  }
 0x1e9   :  { %355 = vperm.xlu0 %460, %v350_v47   ;;  %458 = vset.pattern.permute.xlu2 %v261_v62 }
 0x1ea   :  { %459 = vset.pattern.permute.xlu1 %v268_v58 }
 0x1f1   :  { %329 = vperm.xlu2 %458, %v324_v49   ;;  %462 = vset.pattern.permute.xlu0 %v268_v58 }
 0x1f2   :  { %335 = vperm.xlu1 %459, %v324_v49  }
 0x1f9   :  { %342 = vperm.xlu2 %458, %v337_v50  }
 0x1fa   :  { %348 = vperm.xlu1 %459, %v337_v50  }
 0x201   :  { %461 = vset.pattern.permute.xlu2 %v268_v58 }
 0x209   :  { %361 = vperm.xlu2 %461, %v350_v47  }
 0x223   :  { %v271_v48 = vpop.permute.xlu2 %270 }
 0x224   :  { %v365_v52 = vmul.f32 %v271_v48, %v575_v13  ;;  %v366_v53 = vmul.f32 %v271_v48, %v577_v14 }
 0x226   :  { %397 = vst [vmem:[#allocation5 + $0x10] sm:$0xff] %v365_v52 }
 0x227   :  { %398 = vst [vmem:[#allocation5 + $0x18] sm:$0xff] %v366_v53 }
 0x22b   :  { %v284_v51 = vpop.permute.xlu2 %283 }
 0x22c   :  { %v369_v54 = vmul.f32 %v284_v51, %v571_v11  ;;  %v370_v55 = vmul.f32 %v284_v51, %v573_v12 }
 0x22e   :  { %401 = vst [vmem:[#allocation5 + $0x30] sm:$0xff] %v369_v54 }
 0x22f   :  { %402 = vst [vmem:[#allocation5 + $0x38] sm:$0xff] %v370_v55 }
 0x233   :  { %v297_v60 = vpop.permute.xlu2 %296 }
 0x234   :  { %v373_v57 = vmul.f32 %v297_v60, %v567_v9  ;;  %v374_v62 = vmul.f32 %v297_v60, %v569_v10 }
 0x236   :  { %405 = vst [vmem:[#allocation5 + $0x50] sm:$0xff] %v373_v57 }
 0x237   :  { %406 = vst [vmem:[#allocation5 + $0x58] sm:$0xff] %v374_v62 }
 0x23b   :  { %v278_v58 = vpop.permute.xlu0 %277  ;;  %v310_v13 = vpop.permute.xlu2 %309 }
 0x23c   :  { %v367_v14 = vmul.f32 %v278_v58, %v553_v2  ;;  %v368_v61 = vmul.f32 %v278_v58, %v557_v4  ;;  %v377_v56 = vmul.f32 %v310_v13, %v585_v18  ;;  %v265_v11 = vpop.permute.xlu1 %264  ;;  %v378_v12 = vmul.f32 %v310_v13, %v591_v21 }
 0x23d   :  { %v363_v63 = vmul.f32 %v265_v11, %v559_v5  ;;  %v364_v9 = vmul.f32 %v265_v11, %v561_v6 }
 0x23e   :  { %399 = vst [vmem:[#allocation5 + $0x20] sm:$0xff] %v367_v14 }
 0x23f   :  { %400 = vst [vmem:[#allocation5 + $0x28] sm:$0xff] %v368_v61 }
 0x240   :  { %409 = vst [vmem:[#allocation5 + $0x70] sm:$0xff] %v377_v56 }
 0x241   :  { %410 = vst [vmem:[#allocation5 + $0x78] sm:$0xff] %v378_v12 }
 0x242   :  { %395 = vst [vmem:[#allocation5] sm:$0xff] %v363_v63 }
 0x243   :  { %396 = vst [vmem:[#allocation5 + $0x8] sm:$0xff] %v364_v9 }
 0x244   :  { %v291_v10 = vpop.permute.xlu1 %290 }
 0x245   :  { %v371_v2 = vmul.f32 %v291_v10, %v549_v0  ;;  %v372_v4 = vmul.f32 %v291_v10, %v551_v1 }
 0x247   :  { %403 = vst [vmem:[#allocation5 + $0x40] sm:$0xff] %v371_v2 }
 0x248   :  { %404 = vst [vmem:[#allocation5 + $0x48] sm:$0xff] %v372_v4 }
 0x24b   :  { %v323_v18 = vpop.permute.xlu0 %322  ;;  %v330_v3 = vpop.permute.xlu2 %329 }
 0x24c   :  { %v381_v21 = vmul.f32 %v323_v18, %v611_v31  ;;  %v382_v5 = vmul.f32 %v323_v18, %v613_v32  ;;  %v383_v8 = vmul.f32 %v330_v3, %v603_v27  ;;  %v304_v6 = vpop.permute.xlu1 %303  ;;  %v384_v15 = vmul.f32 %v330_v3, %v609_v30 }
 0x24d   :  { %v375_v17 = vmul.f32 %v304_v6, %v593_v22  ;;  %v376_v0 = vmul.f32 %v304_v6, %v595_v23 }
 0x24e   :  { %413 = vst [vmem:[#allocation5 + $0x90] sm:$0xff] %v381_v21 }
 0x24f   :  { %414 = vst [vmem:[#allocation5 + $0x98] sm:$0xff] %v382_v5 }
 0x250   :  { %415 = vst [vmem:[#allocation5 + $0xa0] sm:$0xff] %v383_v8 }
 0x251   :  { %416 = vst [vmem:[#allocation5 + $0xa8] sm:$0xff] %v384_v15 }
 0x252   :  { %407 = vst [vmem:[#allocation5 + $0x60] sm:$0xff] %v375_v17 }
 0x253   :  { %408 = vst [vmem:[#allocation5 + $0x68] sm:$0xff] %v376_v0  ;;  %v343_v1 = vpop.permute.xlu2 %342 }
 0x254   :  { %v387_v31 = vmul.f32 %v343_v1, %v629_v40  ;;  %v388_v32 = vmul.f32 %v343_v1, %v631_v41  ;;  %v317_v24 = vpop.permute.xlu1 %316 }
 0x255   :  { %v379_v27 = vmul.f32 %v317_v24, %v587_v19  ;;  %v380_v30 = vmul.f32 %v317_v24, %v589_v20 }
 0x256   :  { %419 = vst [vmem:[#allocation5 + $0xc0] sm:$0xff] %v387_v31 }
 0x257   :  { %420 = vst [vmem:[#allocation5 + $0xc8] sm:$0xff] %v388_v32 }
 0x258   :  { %411 = vst [vmem:[#allocation5 + $0x80] sm:$0xff] %v379_v27 }
 0x259   :  { %412 = vst [vmem:[#allocation5 + $0x88] sm:$0xff] %v380_v30 }
 0x25b   :  { %v356_v22 = vpop.permute.xlu0 %355 }
 0x25c   :  { %v391_v23 = vmul.f32 %v356_v22, %v623_v37  ;;  %v392_v25 = vmul.f32 %v356_v22, %v625_v38 }
 0x25e   :  { %423 = vst [vmem:[#allocation5 + $0xe0] sm:$0xff] %v391_v23 }
 0x25f   :  { %424 = vst [vmem:[#allocation5 + $0xe8] sm:$0xff] %v392_v25 }
 0x263   :  { %v362_v26 = vpop.permute.xlu2 %361 }
 0x264   :  { %v393_v40 = vmul.f32 %v362_v26, %v639_v45  ;;  %v394_v41 = vmul.f32 %v362_v26, %v641_v46  ;;  %v336_v7 = vpop.permute.xlu1 %335 }
 0x265   :  { %v385_v19 = vmul.f32 %v336_v7, %v605_v28  ;;  %v386_v20 = vmul.f32 %v336_v7, %v607_v29 }
 0x266   :  { %425 = vst [vmem:[#allocation5 + $0xf0] sm:$0xff] %v393_v40 }
 0x267   :  { %426 = vst [vmem:[#allocation5 + $0xf8] sm:$0xff] %v394_v41 }
 0x268   :  { %417 = vst [vmem:[#allocation5 + $0xb0] sm:$0xff] %v385_v19 }
 0x269   :  { %418 = vst [vmem:[#allocation5 + $0xb8] sm:$0xff] %v386_v20 }
 0x26c   :  { %v349_v37 = vpop.permute.xlu1 %348 }
 0x26d   :  { %v389_v38 = vmul.f32 %v349_v37, %v621_v36  ;;  %v390_v45 = vmul.f32 %v349_v37, %v627_v39 }
 0x26f   :  { %421 = vst [vmem:[#allocation5 + $0xd0] sm:$0xff] %v389_v38 }
 0x270   :  { %422 = vst [vmem:[#allocation5 + $0xd8] sm:$0xff] %v390_v45 }
 0x271   :  { %439 = dma.vmem_to_hbm [thread:$0]  %s432_s23, 4096, %s434_s26, [#allocation4], %s520_s17, %s520_s17, %s521_s18  }
 0x272   :  { %517 = dma.done.wait [#allocation4], 4096  }
 0x273   :  { %518 = vsyncadd [#allocation4], 4294963200 }
 0x274   :  { %444 = vsyncpa [#allocation3], 1 }
 0x275   :  { %445 = vsyncpa [#allocation4], 1 }

</bundles_post_ra>
